<compile_context>
chip_gen: v7x
topology: tpu7x:2x2x1
jax: 0.10.0
libtpu: 0.0.40
codegen_flags: <defaults>
</compile_context>

<pallas_src>
import functools
import math

import numpy as np
import jax
import jax.numpy as jnp
from jax import lax
from jax.experimental import pallas as pl
from jax.experimental.pallas import tpu as pltpu

_LANE = 128


def _round_up(n, m):
    return ((n + m - 1) // m) * m


@functools.lru_cache(maxsize=None)
def _block_diag_mask(batch, seq_len):
    """Additive mask: 0 inside a batch row's own block, -1e30 elsewhere.

    Built host-side with numpy so under jit it is a baked constant — zero
    per-call device work.
    """
    idx = np.arange(batch * seq_len) // seq_len
    m = np.where(idx[:, None] == idx[None, :], 0.0, -1e30).astype(np.float32)
    return jnp.asarray(m)


def _fused_attention_kernel(ids_ref, eqkv_ref, bqkv_ref, mask_ref, o_ref, *, hp):
    # ids_ref  : (bs, vp) int32  — token ids pre-broadcast across lanes
    # eqkv_ref : (vp, 3*hp) f32  — emb @ [Wq*scale | Wk | Wv], zero-padded
    # bqkv_ref : (1, 3*hp)  f32  — [bq*scale | bk | bv], zero-padded
    # mask_ref : (bs, bs)   f32  — additive block-diagonal mask
    # o_ref    : (bs, hp)   f32  — lane-dense output slab
    bs, vp = ids_ref.shape

    # One-hot token selection on the MXU fused with the (pre-fused) QKV
    # projection: a single (bs, vp) x (vp, 3*hp) matmul + one bias add.
    one_hot = (ids_ref[...] ==
               lax.broadcasted_iota(jnp.int32, (bs, vp), 1)).astype(jnp.float32)
    qkv = jnp.dot(one_hot, eqkv_ref[...],
                  preferred_element_type=jnp.float32) + bqkv_ref[...]

    # Static, 128-aligned column slices (no copies, no extra DMAs).
    q = qkv[:, :hp]            # 1/sqrt(H) already folded into these columns
    k = qkv[:, hp:2 * hp]
    v = qkv[:, 2 * hp:]

    # QK^T without materializing k.T: contract both operands on their last axis.
    scores = lax.dot_general(q, k, dimension_numbers=(((1,), (1,)), ((), ())),
                             preferred_element_type=jnp.float32)     # (bs, bs)
    scores = scores + mask_ref[...]

    # Numerically-stable softmax; reciprocal on the otherwise-idle EUP,
    # one Newton step restores full f32 accuracy.
    m = jnp.max(scores, axis=-1, keepdims=True)
    e = jnp.exp(scores - m)
    denom = jnp.sum(e, axis=-1, keepdims=True)
    r = pl.reciprocal(denom, approx=True)
    r = r * (2.0 - denom * r)
    attn = e * r                                                     # (bs, bs)

    o_ref[...] = jnp.dot(attn, v, preferred_element_type=jnp.float32)  # (bs, hp)


def prepare_params(params):
    """One-time fusion + padding of the module parameters.

    Returns (eqkv, bqkv, hidden_size):
      eqkv : (vp, 3*hp) f32  with columns [ (emb @ Wq)*s | emb @ Wk | emb @ Wv ]
      bqkv : (1, 3*hp)  f32  with columns [ bq*s | bk | bv ]
    where s = 1/sqrt(H).  Valid because there is no nonlinearity between the
    embedding lookup and the projections, and the weights are static.
    Zero padding is exact: padded rows/columns contribute nothing and the
    extra output columns are sliced off in the wrapper.
    """
    emb = params["embedding"].astype(jnp.float32)
    V, _E = emb.shape
    H = params["wq"].shape[1]
    scale = 1.0 / math.sqrt(H)

    vp = _round_up(V, _LANE)
    hp = _round_up(H, _LANE)

    def fuse(w, b, s):
        t = (emb @ w.astype(jnp.float32)) * s                       # (V, H)
        bb = b.astype(jnp.float32).reshape(1, -1) * s               # (1, H)
        t_p = jnp.zeros((vp, hp), jnp.float32).at[:V, :H].set(t)
        b_p = jnp.zeros((1, hp), jnp.float32).at[:, :H].set(bb)
        return t_p, b_p

    tq, bq = fuse(params["wq"], params["bq"], scale)
    tk, bk = fuse(params["wk"], params["bk"], 1.0)
    tv, bv = fuse(params["wv"], params["bv"], 1.0)

    eqkv = jnp.concatenate([tq, tk, tv], axis=1)                    # (vp, 3*hp)
    bqkv = jnp.concatenate([bq, bk, bv], axis=1)                    # (1, 3*hp)
    return jax.device_put(eqkv), jax.device_put(bqkv), H


@functools.partial(jax.jit, static_argnames=("hidden_size",))
def transformer_forward(token_ids, eqkv, bqkv, *, hidden_size):
    """token_ids: (B, S) int32 -> (B, S, hidden_size) float32."""
    B, S = token_ids.shape
    bs = B * S
    vp, three_hp = eqkv.shape
    hp = three_hp // 3

    # Lane-dense pre-broadcast of the ids (full-width vreg compare in-kernel).
    ids_b = jnp.broadcast_to(token_ids.reshape(bs, 1).astype(jnp.int32), (bs, vp))
    mask = _block_diag_mask(B, S)                                   # baked constant

    # Whole problem fits easily in VMEM (~0.3 MiB): no grid, whole-array
    # VMEM-resident blocks, one kernel invocation.
    kernel = pl.pallas_call(
        functools.partial(_fused_attention_kernel, hp=hp),
        out_shape=jax.ShapeDtypeStruct((bs, hp), jnp.float32),
        in_specs=[pl.BlockSpec(memory_space=pltpu.MemorySpace.VMEM)] * 4,
        out_specs=pl.BlockSpec(memory_space=pltpu.MemorySpace.VMEM),
    )
    out_flat = kernel(ids_b, eqkv, bqkv, mask)
    return out_flat[:, :hidden_size].reshape(B, S, hidden_size)


def init_params(key, vocab_size, embedding_dim, hidden_size):
    ks = jax.random.split(key, 7)
    # nn.Embedding default: N(0, 1); nn.Linear default: U(-1/sqrt(in), 1/sqrt(in))
    bound = 1.0 / jnp.sqrt(jnp.float32(embedding_dim))
    return {
        "embedding": jax.random.normal(ks[0], (vocab_size, embedding_dim), jnp.float32),
        "wq": jax.random.uniform(ks[1], (embedding_dim, hidden_size), jnp.float32, -bound, bound),
        "bq": jax.random.uniform(ks[2], (1, hidden_size), jnp.float32, -bound, bound),
        "wk": jax.random.uniform(ks[3], (embedding_dim, hidden_size), jnp.float32, -bound, bound),
        "bk": jax.random.uniform(ks[4], (1, hidden_size), jnp.float32, -bound, bound),
        "wv": jax.random.uniform(ks[5], (embedding_dim, hidden_size), jnp.float32, -bound, bound),
        "bv": jax.random.uniform(ks[6], (1, hidden_size), jnp.float32, -bound, bound),
    }


if __name__ == "__main__":
    VOCAB = 100
    EMB = 32
    HIDDEN = 32          # transformer_hidden_size
    B, S = 2, 8

    key = jax.random.PRNGKey(0)
    pkey, xkey = jax.random.split(key)
    params = init_params(pkey, VOCAB, EMB, HIDDEN)
    token_ids = jax.random.randint(xkey, (B, S), 0, VOCAB, dtype=jnp.int32)

    # One-time fusion/padding (hoisted out of the per-call forward path).
    eqkv, bqkv, H = prepare_params(params)

    out = transformer_forward(token_ids, eqkv, bqkv, hidden_size=H)
    out = jax.block_until_ready(out)

    # Pure-JAX reference check (unfused math, exact softmax division).
    x = jnp.take(params["embedding"], token_ids, axis=0)
    q = x @ params["wq"] + params["bq"][0]
    k = x @ params["wk"] + params["bk"][0]
    v = x @ params["wv"] + params["bv"][0]
    scores = jnp.einsum("bqd,bkd->bqk", q, k) / jnp.sqrt(jnp.float32(HIDDEN))
    ref = jnp.einsum("bqk,bkd->bqd", jax.nn.softmax(scores, axis=-1), v)

    assert out.shape == (B, S, HIDDEN)
    assert jnp.allclose(out, ref, atol=1e-3, rtol=1e-3), \
        float(jnp.max(jnp.abs(out - ref)))

    print("KERNEL_OK")
</pallas_src>

<mosaic_0001>
module attributes {stable_mosaic.version = 11 : i64} {
  func.func @_fused_attention_kernel(%arg0: memref<16x128xi32, #tpu.memory_space<vmem>>, %arg1: memref<128x384xf32, #tpu.memory_space<vmem>>, %arg2: memref<1x384xf32, #tpu.memory_space<vmem>>, %arg3: memref<16x16xf32, #tpu.memory_space<vmem>>, %arg4: memref<16x128xf32, #tpu.memory_space<vmem>>) attributes {dimension_semantics = [], scalar_prefetch = 0 : i64, scratch_operands = 0 : i64, tpu.core_type = #tpu.core_type<tc>} {
    %c0 = arith.constant 0 : index
    %c0_0 = arith.constant 0 : index
    %0 = vector.load %arg0[%c0, %c0_0] : memref<16x128xi32, #tpu.memory_space<vmem>>, vector<16x128xi32>
    %1 = tpu.iota {dimensions = array<i32: 1>} : vector<16x128xi32>
    %2 = arith.cmpi eq, %0, %1 : vector<16x128xi32>
    %3 = arith.extui %2 : vector<16x128xi1> to vector<16x128xi32>
    %4 = arith.sitofp %3 : vector<16x128xi32> to vector<16x128xf32>
    %c0_1 = arith.constant 0 : index
    %c0_2 = arith.constant 0 : index
    %5 = vector.load %arg1[%c0_1, %c0_2] : memref<128x384xf32, #tpu.memory_space<vmem>>, vector<128x384xf32>
    %cst = arith.constant dense<0.000000e+00> : vector<16x384xf32>
    %6 = tpu.matmul %4, %5, %cst {dimension_numbers = #tpu.dot_dimension_numbers<[1], [0], [0], [1], [0, 0, 1, 1], [], []>} : vector<16x128xf32>, vector<128x384xf32>, vector<16x384xf32> -> vector<16x384xf32>
    %c0_3 = arith.constant 0 : index
    %c0_4 = arith.constant 0 : index
    %7 = vector.load %arg2[%c0_3, %c0_4] : memref<1x384xf32, #tpu.memory_space<vmem>>, vector<1x384xf32>
    %8 = vector.broadcast %7 : vector<1x384xf32> to vector<16x384xf32>
    %9 = arith.addf %6, %8 : vector<16x384xf32>
    %10 = vector.extract_strided_slice %9 {offsets = [0, 0], sizes = [16, 128], strides = [1, 1]} : vector<16x384xf32> to vector<16x128xf32>
    %11 = vector.extract_strided_slice %9 {offsets = [0, 128], sizes = [16, 128], strides = [1, 1]} : vector<16x384xf32> to vector<16x128xf32>
    %12 = vector.extract_strided_slice %9 {offsets = [0, 256], sizes = [16, 128], strides = [1, 1]} : vector<16x384xf32> to vector<16x128xf32>
    %cst_5 = arith.constant dense<0.000000e+00> : vector<16x16xf32>
    %13 = tpu.matmul %10, %11, %cst_5 {dimension_numbers = #tpu.dot_dimension_numbers<[1], [1], [0], [0], [0, 0, 1, 0], [], []>} : vector<16x128xf32>, vector<16x128xf32>, vector<16x16xf32> -> vector<16x16xf32>
    %c0_6 = arith.constant 0 : index
    %c0_7 = arith.constant 0 : index
    %14 = vector.load %arg3[%c0_6, %c0_7] : memref<16x16xf32, #tpu.memory_space<vmem>>, vector<16x16xf32>
    %15 = arith.addf %13, %14 : vector<16x16xf32>
    %cst_8 = arith.constant dense<0xFF800000> : vector<16xf32>
    %16 = vector.multi_reduction <maximumf>, %15, %cst_8 [1] : vector<16x16xf32> to vector<16xf32>
    %17 = vector.shape_cast %16 : vector<16xf32> to vector<16x1xf32>
    %18 = vector.broadcast %17 : vector<16x1xf32> to vector<16x16xf32>
    %19 = arith.subf %15, %18 : vector<16x16xf32>
    %20 = math.exp %19 : vector<16x16xf32>
    %cst_9 = arith.constant dense<0.000000e+00> : vector<16xf32>
    %21 = vector.multi_reduction <add>, %20, %cst_9 [1] : vector<16x16xf32> to vector<16xf32>
    %22 = vector.shape_cast %21 : vector<16xf32> to vector<16x1xf32>
    %23 = tpu.reciprocal %22 {approx = true} : vector<16x1xf32> -> vector<16x1xf32>
    %24 = arith.mulf %22, %23 : vector<16x1xf32>
    %cst_10 = arith.constant 2.000000e+00 : f32
    %25 = vector.broadcast %cst_10 : f32 to vector<16x1xf32>
    %26 = arith.subf %25, %24 : vector<16x1xf32>
    %27 = arith.mulf %23, %26 : vector<16x1xf32>
    %28 = vector.broadcast %27 : vector<16x1xf32> to vector<16x16xf32>
    %29 = arith.mulf %20, %28 : vector<16x16xf32>
    %cst_11 = arith.constant dense<0.000000e+00> : vector<16x128xf32>
    %30 = tpu.matmul %29, %12, %cst_11 {dimension_numbers = #tpu.dot_dimension_numbers<[1], [0], [0], [1], [0, 0, 1, 1], [], []>} : vector<16x16xf32>, vector<16x128xf32>, vector<16x128xf32> -> vector<16x128xf32>
    %c0_12 = arith.constant 0 : index
    %c0_13 = arith.constant 0 : index
    %31 = vector.load %arg4[%c0_12, %c0_13] : memref<16x128xf32, #tpu.memory_space<vmem>>, vector<16x128xf32>
    tpu.vector_store %arg4[%c0_12, %c0_13], %30 {strides = array<i32>} : memref<16x128xf32, #tpu.memory_space<vmem>>, vector<16x128xf32>,
    return
  }
}

</mosaic_0001>

<bundles_post_ra>
// kernel: transformer_forward.1
= control target key start
LH: loop header
LB: loop body
LE: loop exit
PB: predicated region body
PF: predicated region fallthrough
CT: control target
= control target key end

     0   :  { %9 = vsyncpa [#allocation3], 0  ;;  %s644_s15 = smov [#allocation2]   ;;  %s746_s0 = inlined_call_operand.vmem [shape: s32[16,128], index: 0, kind: input, shape index: {}]   ;;  %s747_s1 = inlined_call_operand.hbm [shape: f32[128,384], index: 1, kind: input, shape index: {}]   ;;  %s748_s2 = inlined_call_operand.vmem [shape: f32[1,384], index: 2, kind: input, shape index: {}]   ;;  %s749_s3 = inlined_call_operand.vmem [shape: f32[16,16], index: 3, kind: input, shape index: {}]   ;;  %s750_s4 = inlined_call_operand.vmem [shape: f32[16,128], index: 4, kind: output, shape index: {}]  }
   0x1   :  { %s17_s16 = sshll.u32 %s644_s15, 4  ;;  %s620_s19 = scalar_lea.hbm %s747_s1, 6144  ;;  %s18_s16 = int_to_ptr.vmem [resolvable:$true] %s17_s16 }
   0x2   :  { %p621_p0 = scmp.ne.s32.totalorder %s747_s1, %s620_s19  ;;  %p624_p1 = scmp.lt.u32.totalorder %s620_s19, %s747_s1 }
   0x4   :  { %p626_p2 = pnand %p624_p1, %p621_p0 }
   0x6   :  { %629 = shalt.err (!%p626_p2)
}
   0x7   :  { %s630_s24 = scalar_lea.vmem %s18_s16, 6144  ;;  %p635_p4 = scmp.lt.s32.totalorder %s18_s16, %s18_s16 }
   0x8   :  { %p631_p3 = scmp.ne.s32.totalorder %s18_s16, %s630_s24  ;;  %p636_p5 = scmp.lt.s32.totalorder %s630_s24, %s630_s24 }
   0xa   :  { %p637_p6 = por %p636_p5, %p635_p4 }
   0xc   :  { %p638_p7 = pnand %p637_p6, %p631_p3 }
   0xe   :  { %641 = shalt.err (!%p638_p7)
}
   0xf   :  { %s645_s25 = smov 384   ;;  %s646_s26 = smov 24  }
  0x10   :  { %23 = dma.hbm_to_vmem [thread:$0]  %s747_s1, 6144, %s18_s16, [#allocation3], %s645_s25, %s645_s25, %s646_s26  }
  0x11   :  { %642 = dma.done.wait [#allocation3], 6144  }
  0x12   :  { %643 = vsyncadd [#allocation3], 4294961152  ;;  %v647_v0 = vmov 0.0   ;;  %v42_v1 = vld [vmem:[#allocation2 + $0x8] sm:$0xff]  ;;  %v45_v2 = vld [vmem:[#allocation2 + $0x20] sm:$0xff]  ;;  %v33_v14 = vlaneseq  ;;  %v648_v30 = vmov 1.0  }
  0x13   :  { %170 = vmatprep.mubr.f32.mxu0 %v647_v0  ;;  %v41_v3 = vld [vmem:[#allocation2] sm:$0xff]  ;;  %v535_v4 = vpack.c.bf16 %v45_v2, %v42_v1  ;;  %v44_v5 = vld [vmem:[#allocation2 + $0x18] sm:$0xff]  ;;  %v51_v7 = vld [vmem:[#allocation2 + $0x50] sm:$0xff]  ;;  %vm335_vm2 = vcmask 130048  }
  0x14   :  { %v48_v6 = vld [vmem:[#allocation2 + $0x38] sm:$0xff]  ;;  %v537_v8 = vpack.c.bf16 %v44_v5, %v41_v3  ;;  %v47_v10 = vld [vmem:[#allocation2 + $0x30] sm:$0xff]  ;;  %v50_v11 = vld [vmem:[#allocation2 + $0x48] sm:$0xff]  ;;  %v687_v21 = vand.u32 127, %v33_v14  ;;  %v711_v54 = vshrl.u32 %v33_v14, 7 }
  0x15   :  { %v539_v9 = vpack.c.bf16 %v51_v7, %v48_v6  ;;  %v54_v12 = vld [vmem:[#allocation2 + $0x68] sm:$0xff]  ;;  %536 = vmatprep.subr.bf16.mxu0 %v535_v4  ;;  %v57_v13 = vld [vmem:[#allocation2 + $0x80] sm:$0xff]  ;;  %v541_v15 = vpack.c.bf16 %v50_v11, %v47_v10  ;;  %v56_v18 = vld [vmem:[#allocation2 + $0x78] sm:$0xff] }
  0x16   :  { %538 = vmatpush1.bf16.msra.mxu0 %v537_v8  ;;  %v543_v16 = vpack.c.bf16 %v57_v13, %v54_v12  ;;  %v53_v17 = vld [vmem:[#allocation2 + $0x60] sm:$0xff]  ;;  %v60_v19 = vld [vmem:[#allocation2 + $0x98] sm:$0xff]  ;;  %v63_v20 = vld [vmem:[#allocation2 + $0xb0] sm:$0xff]  ;;  %v93_v55 = vsub.s32 0, %v711_v54  ;;  %v97_v58 = vsub.s32 1, %v711_v54 }
  0x17   :  { %540 = vmatprep.subr.bf16.mxu0 %v539_v9  ;;  %v545_v22 = vpack.c.bf16 %v56_v18, %v53_v17  ;;  %v547_v23 = vpack.c.bf16 %v63_v20, %v60_v19  ;;  %v59_v24 = vld [vmem:[#allocation2 + $0x90] sm:$0xff]  ;;  %v62_v25 = vld [vmem:[#allocation2 + $0xa8] sm:$0xff]  ;;  %v69_v27 = vld [vmem:[#allocation2 + $0xe0] sm:$0xff] }
  0x18   :  { %v66_v26 = vld [vmem:[#allocation2 + $0xc8] sm:$0xff]  ;;  %v31_v28 = vld [vmem:[%s746_s0] sm:$0xff]  ;;  %v549_v29 = vpack.c.bf16 %v62_v25, %v59_v24  ;;  %v65_v32 = vld [vmem:[#allocation2 + $0xc0] sm:$0xff] }
  0x19   :  { %vm35_vm0 = vcmp.eq.s32.totalorder %v31_v28, %v687_v21  ;;  %v551_v31 = vpack.c.bf16 %v69_v27, %v66_v26  ;;  %v68_v33 = vld [vmem:[#allocation2 + $0xd8] sm:$0xff]  ;;  %v75_v35 = vld [vmem:[#allocation2 + $0x110] sm:$0xff]  ;;  %v74_v39 = vld [vmem:[#allocation2 + $0x108] sm:$0xff] }
  0x1a   :  { %542 = vmatpush1.bf16.msra.mxu0 %v541_v15  ;;  %518 = vmatprep.mubr.msk.f32.mxu1 %vm35_vm0, %v648_v30  ;;  %v72_v34 = vld [vmem:[#allocation2 + $0xf8] sm:$0xff]  ;;  %v553_v36 = vpack.c.bf16 %v68_v33, %v65_v32  ;;  %v71_v38 = vld [vmem:[#allocation2 + $0xf0] sm:$0xff]  ;;  %v78_v40 = vld [vmem:[#allocation2 + $0x128] sm:$0xff] }
  0x1b   :  { %544 = vmatprep.subr.bf16.mxu0 %v543_v16  ;;  %v555_v37 = vpack.c.bf16 %v75_v35, %v72_v34  ;;  %v81_v41 = vld [vmem:[#allocation2 + $0x140] sm:$0xff]  ;;  %v557_v42 = vpack.c.bf16 %v74_v39, %v71_v38  ;;  %v80_v45 = vld [vmem:[#allocation2 + $0x138] sm:$0xff]  ;;  %v87_v47 = vld [vmem:[#allocation2 + $0x170] sm:$0xff] }
  0x1c   :  { %v559_v43 = vpack.c.bf16 %v81_v41, %v78_v40  ;;  %v77_v44 = vld [vmem:[#allocation2 + $0x120] sm:$0xff]  ;;  %v84_v46 = vld [vmem:[#allocation2 + $0x158] sm:$0xff]  ;;  %v83_v50 = vld [vmem:[#allocation2 + $0x150] sm:$0xff] }
  0x1d   :  { %v561_v48 = vpack.c.bf16 %v80_v45, %v77_v44  ;;  %v563_v49 = vpack.c.bf16 %v87_v47, %v84_v46  ;;  %v86_v51 = vld [vmem:[#allocation2 + $0x168] sm:$0xff]  ;;  %v699_v53 = vld [vmem:[%s746_s0 + $0x8] sm:$0xff]  ;;  %v717_v56 = vld [vmem:[%s748_s2] sm:$0x7]  ;;  %v101_v47 = vsub.s32 2, %v711_v54 }
  0x1e   :  { %546 = vmatpush1.bf16.msra.mxu0 %v545_v22  ;;  %v565_v52 = vpack.c.bf16 %v86_v51, %v83_v50  ;;  %vm36_vm1 = vcmp.eq.s32.totalorder %v699_v53, %v687_v21  ;;  %v94_v57 = vrot.slane %v717_v56, %v93_v55  ;;  %v98_v62 = vrot.slane %v717_v56, %v97_v58  ;;  %v43_v5 = vld [vmem:[#allocation2 + $0x10] sm:$0xff]  ;;  %v46_v6 = vld [vmem:[#allocation2 + $0x28] sm:$0xff]  ;;  %v49_v7 = vld [vmem:[#allocation2 + $0x40] sm:$0xff] }
  0x1f   :  { %548 = vmatprep.subr.bf16.mxu0 %v547_v23  ;;  %v567_v8 = vpack.c.bf16 %v46_v6, %v43_v5  ;;  %v52_v9 = vld [vmem:[#allocation2 + $0x58] sm:$0xff]  ;;  %v55_v11 = vld [vmem:[#allocation2 + $0x70] sm:$0xff]  ;;  %v58_v12 = vld [vmem:[#allocation2 + $0x88] sm:$0xff] }
  0x20   :  { %v571_v10 = vpack.c.bf16 %v52_v9, %v49_v7  ;;  %v575_v13 = vpack.c.bf16 %v58_v12, %v55_v11  ;;  %v61_v14 = vld [vmem:[#allocation2 + $0xa0] sm:$0xff]  ;;  %v64_v15 = vld [vmem:[#allocation2 + $0xb8] sm:$0xff]  ;;  %v67_v17 = vld [vmem:[#allocation2 + $0xd0] sm:$0xff] }
  0x21   :  { %568 = vmatprep.subr.bf16.mxu1 %v567_v8  ;;  %v579_v16 = vpack.c.bf16 %v64_v15, %v61_v14  ;;  %v70_v18 = vld [vmem:[#allocation2 + $0xe8] sm:$0xff]  ;;  %v73_v20 = vld [vmem:[#allocation2 + $0x100] sm:$0xff]  ;;  %v76_v22 = vld [vmem:[#allocation2 + $0x118] sm:$0xff] }
  0x22   :  { %550 = vmatpush1.bf16.msra.mxu0 %v549_v29  ;;  %570 = vmatpush3.bf16.msra.mxu1 %v567_v8  ;;  %v583_v19 = vpack.c.bf16 %v70_v18, %v67_v17  ;;  %v587_v23 = vpack.c.bf16 %v76_v22, %v73_v20  ;;  %v79_v24 = vld [vmem:[#allocation2 + $0x130] sm:$0xff]  ;;  %v82_v25 = vld [vmem:[#allocation2 + $0x148] sm:$0xff]  ;;  %v85_v27 = vld [vmem:[#allocation2 + $0x160] sm:$0xff] }
  0x23   :  { %552 = vmatprep.subr.bf16.mxu0 %v551_v31  ;;  %572 = vmatprep.subr.bf16.mxu1 %v571_v10  ;;  %v591_v26 = vpack.c.bf16 %v82_v25, %v79_v24  ;;  %v88_v28 = vld [vmem:[#allocation2 + $0x178] sm:$0xff]  ;;  %v258_v31 = vld [vmem:[%s749_s3] sm:$0xff] }
  0x24   :  { %v595_v29 = vpack.c.bf16 %v88_v28, %v85_v27  ;;  %v259_v33 = vld [vmem:[%s749_s3 + $0x8] sm:$0xff] }
  0x26   :  { %554 = vmatpush1.bf16.msra.mxu0 %v553_v36  ;;  %574 = vmatpush3.bf16.msra.mxu1 %v571_v10 }
  0x27   :  { %556 = vmatprep.subr.bf16.mxu0 %v555_v37  ;;  %576 = vmatprep.subr.bf16.mxu1 %v575_v13 }
  0x2a   :  { %558 = vmatpush1.bf16.msra.mxu0 %v557_v42  ;;  %578 = vmatpush3.bf16.msra.mxu1 %v575_v13 }
  0x2b   :  { %560 = vmatprep.subr.bf16.mxu0 %v559_v43  ;;  %580 = vmatprep.subr.bf16.mxu1 %v579_v16 }
  0x2e   :  { %562 = vmatpush1.bf16.msra.mxu0 %v561_v48  ;;  %582 = vmatpush3.bf16.msra.mxu1 %v579_v16  ;;  %v102_v48 = vrot.slane %v717_v56, %v101_v47 }
  0x2f   :  { %564 = vmatprep.subr.bf16.mxu0 %v563_v49  ;;  %584 = vmatprep.subr.bf16.mxu1 %v583_v19 }
  0x32   :  { %566 = vmatpush1.bf16.msra.mxu0 %v565_v52  ;;  %586 = vmatpush3.bf16.msra.mxu1 %v583_v19 }
  0x33   :  { %588 = vmatprep.subr.bf16.mxu1 %v587_v23 }
  0x35   :  { %454 = vmatmul.mubr.msk.f32.vlgmr.msra.gmra.mrb[0].mxu0 %vm35_vm0, %v648_v30 }
  0x36   :  { %176 = vmatprep.mubr.f32.mxu0 %v647_v0  ;;  %590 = vmatpush3.bf16.msra.mxu1 %v587_v23 }
  0x37   :  { %592 = vmatprep.subr.bf16.mxu1 %v591_v26 }
  0x39   :  { %455 = vmatmul.mubr.msk.f32.gmra.mrb[2].mxu0 %vm36_vm1, %v648_v30 }
  0x3a   :  { %594 = vmatpush3.bf16.msra.mxu1 %v591_v26 }
  0x3b   :  { %596 = vmatprep.subr.bf16.mxu1 %v595_v29 }
  0x3e   :  { %598 = vmatpush3.bf16.msra.mxu1 %v595_v29 }
  0x41   :  { %519 = vmatmul.mubr.msk.f32.vlgmr.msra.gmra.mrb[0].mxu1 %vm36_vm1, %v648_v30 }
 0x108   :  { %v172_v59 = vpop.f32.mrb[0].mxu0 }
 0x109   :  { %v173_v60 = vadd.f32 %v172_v59, %v94_v57  ;;  %v174_v61 = vpop.f32.mrb[1].mxu0 }
 0x10a   :  { %v175_v1 = vadd.f32 %v174_v61, %v98_v62 }
 0x10b   :  { %525 = vmatprep.mubr.f32.mxu0 %v173_v60 }
 0x10c   :  { %v178_v63 = vpop.f32.mrb[2].mxu0 }
 0x10d   :  { %v180_v0 = vpop.f32.mrb[3].mxu0  ;;  %v179_v4 = vadd.f32 %v178_v63, %v94_v57 }
 0x10e   :  { %v181_v2 = vadd.f32 %v180_v0, %v98_v62 }
 0x110   :  { %v599_v3 = vpack.c.bf16 %v181_v2, %v175_v1 }
 0x112   :  { %600 = vmatprep.subr.bf16.mxu0 %v599_v3 }
 0x113   :  { %602 = vmatpush3.bf16.xpose.msra.mxu0 %v599_v3 }
 0x114   :  { %v520_v49 = vpop.f32.mrb[0].mxu1 }
 0x115   :  { %v249_v50 = vpop.f32.mrb[1].mxu1  ;;  %v255_v51 = vadd.f32 %v520_v49, %v102_v48 }
 0x116   :  { %v250_v52 = vadd.f32 %v249_v50, %v102_v48 }
 0x118   :  { %v603_v53 = vpack.c.bf16 %v255_v51, %v250_v52 }
 0x11a   :  { %526 = vmatmul.mubr.f32.vlgmr.msra.gmra.mrb[4].mxu0 %v179_v4  ;;  %604 = vmatprep.subr.bf16.mxu1 %v603_v53 }
 0x11b   :  { %606 = vmatpush3.bf16.msra.mxu1 %v603_v53 }
 0x1ed   :  { %v527_v32 = vpop.f32.mrb[4].mxu0 }
 0x1ee   :  { %v326_v34 = vpop.f32.mrb[5].mxu0  ;;  %v332_v36 = vadd.f32 %v527_v32, %v259_v33 }
 0x1ef   :  { %v327_v35 = vadd.f32 %v326_v34, %v258_v31 }
 0x1f0   :  { %v339_v38 = vsel %vm335_vm2, %v332_v36, -inf }
 0x1f1   :  { %v336_v37 = vsel %vm335_vm2, %v327_v35, -inf }
 0x1f2   :  { %337 = vmax.xlane.f32.xlu0 %v336_v37 }
 0x1f6   :  { %340 = vmax.xlane.f32.xlu0 %v339_v38 }
 0x27f   :  { %v338_v21 = vpop.xlane.xlu0 %337 }
 0x280   :  { %v342_v30 = vsub.f32 %v327_v35, %v338_v21 }
 0x282   :  { %v344_v39 = vmul.f32 1.442695, %v342_v30 }
 0x283   :  { %v341_v40 = vpop.xlane.xlu0 %340 }
 0x284   :  { %612 = vpow2.f32 %v344_v39  ;;  %v343_v41 = vsub.f32 %v332_v36, %v341_v40 }
 0x286   :  { %v346_v42 = vmul.f32 1.442695, %v343_v41 }
 0x288   :  { %614 = vpow2.f32 %v346_v42 }
 0x28e   :  { %v613_v43 = vpop.eup %612 }
 0x28f   :  { %v348_v44 = vsel %vm335_vm2, %v613_v43, 0.0 }
 0x290   :  { %349 = vadd.xlane.f32.xlu1 %v348_v44 }
 0x292   :  { %v615_v45 = vpop.eup %614 }
 0x293   :  { %v351_v46 = vsel %vm335_vm2, %v615_v45, 0.0 }
 0x294   :  { %352 = vadd.xlane.f32.xlu1 %v351_v46 }
 0x31d   :  { %v350_v55 = vpop.xlane.xlu1 %349 }
 0x31e   :  { %616 = vrcp.f32 %v350_v55 }
 0x321   :  { %v353_v57 = vpop.xlane.xlu1 %352 }
 0x322   :  { %618 = vrcp.f32 %v353_v57 }
 0x328   :  { %v617_v58 = vpop.eup %616 }
 0x329   :  { %v356_v59 = vmul.f32 %v617_v58, %v350_v55 }
 0x32b   :  { %v358_v60 = vsub.f32 2.0, %v356_v59 }
 0x32c   :  { %v619_v61 = vpop.eup %618 }
 0x32d   :  { %v360_v62 = vmul.f32 %v617_v58, %v358_v60  ;;  %v357_v63 = vmul.f32 %v619_v61, %v353_v57 }
 0x32f   :  { %v362_v54 = vmul.f32 %v613_v43, %v360_v62  ;;  %v359_v0 = vsub.f32 2.0, %v357_v63 }
 0x331   :  { %v361_v56 = vmul.f32 %v619_v61, %v359_v0  ;;  %532 = vmatprep.mubr.msk.f32.mxu1 %vm335_vm2, %v362_v54 }
 0x333   :  { %v363_v1 = vmul.f32 %v615_v45, %v361_v56 }
 0x335   :  { %533 = vmatmul.mubr.msk.f32.vlgmr.msra.gmra.mrb[2].mxu1 %vm335_vm2, %v363_v1 }
 0x408   :  { %v534_v2 = vpop.f32.mrb[2].mxu1 }
 0x409   :  { %446 = vst [vmem:[%s750_s4 + $0x8] sm:$0xff] %v534_v2  ;;  %v436_v3 = vpop.f32.mrb[3].mxu1 }
 0x40a   :  { %445 = vst [vmem:[%s750_s4] sm:$0xff] %v436_v3 }
 0x40b   :  { %451 = vsyncpa [#allocation3], 1 }

</bundles_post_ra>
